<compile_context>
chip_gen: v5e
topology: v5e:2x2
jax: 0.10.0
libtpu: 0.0.40
codegen_flags: <defaults>
</compile_context>

<pallas_src>
import functools

import jax
import jax.numpy as jnp
from jax.experimental import pallas as pl
from jax.experimental.pallas import tpu as pltpu

BN_EPS = 1e-5
LANE = 128                                    # pad every feature dim to this
DEFAULT_BLOCK_ROWS = 256                      # row tile (multiple of 256 for v6e/v7x MXU)
SINGLE_BLOCK_VMEM_BUDGET = 16 * 1024 * 1024   # conservative for v7x (64 MiB phys / 32 MiB scoped)


def _round_up(x, m):
    return (x + m - 1) // m * m


# ----------------------------------------------------------------------------
# In-kernel helpers
# ----------------------------------------------------------------------------
def _mxu_row_sums(y):
    """sum(y, axis=0) and sum(y*y, axis=0) as [1, H] rows, via ones-matmul on the
    MXU so the cross-sublane reduction stays off the XLU/VPU (single sweep)."""
    ones = jnp.ones((8, y.shape[0]), jnp.float32)
    s = jnp.dot(ones, y, preferred_element_type=jnp.float32)[0:1, :]
    ss = jnp.dot(ones, y * y, preferred_element_type=jnp.float32)[0:1, :]
    return s, ss


def _bn_scale_shift(s, ss, gamma, beta, inv_n):
    """Fold training-mode BN into a single multiply-add: y_bn = scale*y + shift."""
    mean = s * inv_n
    var = jnp.maximum(ss * inv_n - mean * mean, 0.0)   # clamp vs. cancellation
    scale = gamma * jax.lax.rsqrt(var + BN_EPS)        # rsqrt -> EUP slot
    shift = beta - scale * mean
    return scale, shift


# ----------------------------------------------------------------------------
# Kernels
# ----------------------------------------------------------------------------
def _mlp_fused_kernel(num_layers, n_rows, x_ref, *rest):
    """Whole-MLP fused kernel (small N, everything VMEM-resident, no grid).

    rest = (w_0..w_{L-1}, bn_packed, b_last, o_ref)
      w_l:       [Din_l_p, Dout_l_p] bf16 (pre-transposed, lane-dense)
      bn_packed: [2*(L-1), H_p] f32, rows alternate gamma_l, beta_l
      b_last:    [1, Dout_p] f32
    """
    w_refs = rest[:num_layers]
    bn_ref = rest[num_layers]
    b_last_ref = rest[num_layers + 1]
    o_ref = rest[num_layers + 2]

    inv_n = 1.0 / n_rows
    bn = bn_ref[...]
    h = x_ref[...]
    for l in range(num_layers - 1):
        # Hidden bias dropped: training-mode BN mean subtraction cancels it exactly.
        y = jnp.dot(h.astype(jnp.bfloat16), w_refs[l][...],
                    preferred_element_type=jnp.float32)
        s, ss = _mxu_row_sums(y)
        scale, shift = _bn_scale_shift(
            s, ss, bn[2 * l:2 * l + 1, :], bn[2 * l + 1:2 * l + 2, :], inv_n)
        h = jnp.maximum(scale * y + shift, 0.0)
    out = jnp.dot(h.astype(jnp.bfloat16), w_refs[num_layers - 1][...],
                  preferred_element_type=jnp.float32) + b_last_ref[...]
    o_ref[...] = out.astype(o_ref.dtype)


def _linear_kernel(x_ref, w_ref, b_ref, o_ref):
    # num_layers == 1 path: plain linear layer.
    y = jnp.dot(x_ref[...].astype(jnp.bfloat16), w_ref[...],
                preferred_element_type=jnp.float32) + b_ref[...]
    o_ref[...] = y.astype(o_ref.dtype)


def _first_layer_kernel(x_ref, w_ref, y_ref, stats_ref):
    """Tiled path, layer 0: y0 = x @ W0, accumulate sum/sumsq of y0 over row tiles."""
    @pl.when(pl.program_id(0) == 0)
    def _():
        stats_ref[...] = jnp.zeros_like(stats_ref)
    y = jnp.dot(x_ref[...].astype(jnp.bfloat16), w_ref[...],
                preferred_element_type=jnp.float32)
    y_ref[...] = y
    s, ss = _mxu_row_sums(y)
    stats_ref[0:1, :] += s
    stats_ref[1:2, :] += ss


def _mid_layer_kernel(n_rows, block_rows, y_prev_ref, stats_prev_ref, gamma_ref,
                      beta_ref, w_ref, y_ref, stats_ref):
    """Tiled path, layer l: apply BN_{l-1}+ReLU, matmul W_l, accumulate new stats."""
    i = pl.program_id(0)

    @pl.when(i == 0)
    def _():
        stats_ref[...] = jnp.zeros_like(stats_ref)

    inv_n = 1.0 / n_rows
    scale, shift = _bn_scale_shift(stats_prev_ref[0:1, :], stats_prev_ref[1:2, :],
                                   gamma_ref[...], beta_ref[...], inv_n)
    h = jnp.maximum(scale * y_prev_ref[...] + shift, 0.0)
    # Zero the rows beyond the true batch (row padding) so they do not pollute
    # this layer's batch statistics.
    row = jax.lax.broadcasted_iota(jnp.int32, h.shape, 0) + i * block_rows
    h = jnp.where(row < n_rows, h, 0.0)

    y = jnp.dot(h.astype(jnp.bfloat16), w_ref[...],
                preferred_element_type=jnp.float32)
    y_ref[...] = y
    s, ss = _mxu_row_sums(y)
    stats_ref[0:1, :] += s
    stats_ref[1:2, :] += ss


def _final_layer_kernel(n_rows, y_prev_ref, stats_prev_ref, gamma_ref, beta_ref,
                        w_ref, b_ref, o_ref):
    """Tiled path, last layer: apply BN+ReLU then the final (biased) linear."""
    inv_n = 1.0 / n_rows
    scale, shift = _bn_scale_shift(stats_prev_ref[0:1, :], stats_prev_ref[1:2, :],
                                   gamma_ref[...], beta_ref[...], inv_n)
    h = jnp.maximum(scale * y_prev_ref[...] + shift, 0.0)
    o_ref[...] = (jnp.dot(h.astype(jnp.bfloat16), w_ref[...],
                          preferred_element_type=jnp.float32) + b_ref[...])


# ----------------------------------------------------------------------------
# pallas_call wrappers
# ----------------------------------------------------------------------------
def _full_spec(shape):
    nd = len(shape)
    return pl.BlockSpec(shape, lambda: (0,) * nd)


def _mlp_fused(x_pad, params, num_layers):
    n = x_pad.shape[0]
    weights = params["weights"]
    out_dim_p = weights[-1].shape[1]
    in_arrays = [x_pad, *weights, params["bn"], params["b_last"]]
    return pl.pallas_call(
        functools.partial(_mlp_fused_kernel, num_layers, n),
        out_shape=jax.ShapeDtypeStruct((n, out_dim_p), jnp.float32),
        in_specs=[_full_spec(a.shape) for a in in_arrays],
        out_specs=_full_spec((n, out_dim_p)),
        compiler_params=pltpu.CompilerParams(vmem_limit_bytes=32 * 1024 * 1024),
    )(*in_arrays)


def _linear(x_pad, w, b):
    # TODO(synk): add a row grid for very large N in the single-layer case.
    n = x_pad.shape[0]
    out_dim_p = w.shape[1]
    return pl.pallas_call(
        _linear_kernel,
        out_shape=jax.ShapeDtypeStruct((n, out_dim_p), jnp.float32),
        in_specs=[_full_spec(x_pad.shape), _full_spec(w.shape), _full_spec(b.shape)],
        out_specs=_full_spec((n, out_dim_p)),
    )(x_pad, w, b)


def _mlp_tiled(x_pad, params, num_layers, block_rows):
    """Row-tiled path: one pallas_call per layer; BN-apply of layer l fused into
    layer l+1's matmul; weights/BN params VMEM-resident across row tiles."""
    n = x_pad.shape[0]
    n_pad = _round_up(n, block_rows)
    if n_pad != n:
        # Zero row padding is safe: zero rows produce zero y (no hidden bias) and
        # later layers mask padded rows before their matmul.
        x_pad = jnp.zeros((n_pad, x_pad.shape[1]), x_pad.dtype).at[:n, :].set(x_pad)
    grid = (n_pad // block_rows,)

    weights = params["weights"]
    bn = params["bn"]
    h_p = weights[0].shape[1]

    def row_spec(width):
        return pl.BlockSpec((block_rows, width), lambda i: (i, 0))

    def const_spec(shape):
        nd = len(shape)
        return pl.BlockSpec(shape, lambda i: (0,) * nd)

    acc_params = pltpu.CompilerParams(dimension_semantics=("arbitrary",))

    # Layer 0: y0 + stats0.
    y, stats = pl.pallas_call(
        _first_layer_kernel,
        grid=grid,
        in_specs=[row_spec(x_pad.shape[1]), const_spec(weights[0].shape)],
        out_specs=(row_spec(h_p), const_spec((2, h_p))),
        out_shape=(jax.ShapeDtypeStruct((n_pad, h_p), jnp.float32),
                   jax.ShapeDtypeStruct((2, h_p), jnp.float32)),
        compiler_params=acc_params,
    )(x_pad, weights[0])

    # Middle hidden layers: apply BN_{l-1}+ReLU, matmul W_l, new stats.
    for l in range(1, num_layers - 1):
        gamma = bn[2 * (l - 1):2 * (l - 1) + 1, :]
        beta = bn[2 * (l - 1) + 1:2 * (l - 1) + 2, :]
        y, stats = pl.pallas_call(
            functools.partial(_mid_layer_kernel, n, block_rows),
            grid=grid,
            in_specs=[row_spec(h_p), const_spec((2, h_p)), const_spec((1, h_p)),
                      const_spec((1, h_p)), const_spec(weights[l].shape)],
            out_specs=(row_spec(h_p), const_spec((2, h_p))),
            out_shape=(jax.ShapeDtypeStruct((n_pad, h_p), jnp.float32),
                       jax.ShapeDtypeStruct((2, h_p), jnp.float32)),
            compiler_params=acc_params,
        )(y, stats, gamma, beta, weights[l])

    # Final layer: apply last BN+ReLU, biased linear. No stats -> "parallel".
    last = num_layers - 1
    gamma = bn[2 * (last - 1):2 * (last - 1) + 1, :]
    beta = bn[2 * (last - 1) + 1:2 * (last - 1) + 2, :]
    out_dim_p = weights[last].shape[1]
    out = pl.pallas_call(
        functools.partial(_final_layer_kernel, n),
        grid=grid,
        in_specs=[row_spec(h_p), const_spec((2, h_p)), const_spec((1, h_p)),
                  const_spec((1, h_p)), const_spec(weights[last].shape),
                  const_spec(params["b_last"].shape)],
        out_specs=row_spec(out_dim_p),
        out_shape=jax.ShapeDtypeStruct((n_pad, out_dim_p), jnp.float32),
        compiler_params=pltpu.CompilerParams(dimension_semantics=("parallel",)),
    )(y, stats, gamma, beta, weights[last], params["b_last"])
    return out[:n]


def _single_block_vmem_estimate(n, params):
    # Rough upper bound: all weights + ~3 live f32 activation copies.
    w_bytes = sum(w.size * w.dtype.itemsize for w in params["weights"])
    widths = [params["weights"][0].shape[0]] + [w.shape[1] for w in params["weights"]]
    act_bytes = 4 * n * max(widths) * 3
    return w_bytes + act_bytes


# ----------------------------------------------------------------------------
# Parameter setup + forward
# ----------------------------------------------------------------------------
def init_mlp_params(key, num_layers, input_dim, hidden_dim, output_dim):
    """nn.Linear-style U(-1/sqrt(fan_in), +1/sqrt(fan_in)) init; BN gamma=1, beta=0.

    Weights are stored pre-transposed [Din_p, Dout_p], zero-padded to lane-dense
    (multiples of 128) and cast to bf16.  Padded gamma/beta are 0 and padded weight
    rows/cols are 0 so padded features stay exactly 0.  Hidden biases are kept only
    for the reference (the kernels drop them; BN cancels them exactly)."""
    if num_layers < 1:
        raise ValueError("number of layers should be positive!")
    din_p = _round_up(input_dim, LANE)
    h_p = _round_up(hidden_dim, LANE)
    dout_p = _round_up(output_dim, LANE)

    if num_layers == 1:
        dims = [(input_dim, output_dim, din_p, dout_p)]
    else:
        dims = [(input_dim, hidden_dim, din_p, h_p)]
        dims += [(hidden_dim, hidden_dim, h_p, h_p)] * (num_layers - 2)
        dims += [(hidden_dim, output_dim, h_p, dout_p)]

    weights, hidden_biases, b_last = [], [], None
    for idx, (din, dout, dinp, doutp) in enumerate(dims):
        key, kw, kb = jax.random.split(key, 3)
        bound = float(1.0 / (din ** 0.5))
        w = jax.random.uniform(kw, (din, dout), jnp.float32, -bound, bound)
        w_pad = jnp.zeros((dinp, doutp), jnp.float32).at[:din, :dout].set(w)
        weights.append(w_pad.astype(jnp.bfloat16))
        b = jax.random.uniform(kb, (1, dout), jnp.float32, -bound, bound)
        b_pad = jnp.zeros((1, doutp), jnp.float32).at[:, :dout].set(b)
        if idx == len(dims) - 1:
            b_last = b_pad
        else:
            hidden_biases.append(b_pad)

    params = {"weights": weights, "b_last": b_last, "hidden_biases": hidden_biases}
    if num_layers > 1:
        bn = jnp.zeros((2 * (num_layers - 1), h_p), jnp.float32)
        bn = bn.at[0::2, :hidden_dim].set(1.0)   # gamma=1 on real cols, 0 on padding
        params["bn"] = bn
    return params


@functools.partial(jax.jit, static_argnames=("num_layers", "output_dim", "block_rows"))
def mlp_forward(params, x, num_layers, output_dim, block_rows=DEFAULT_BLOCK_ROWS):
    n, din = x.shape
    din_p = params["weights"][0].shape[0]
    x = x.astype(jnp.float32)
    x_pad = (jnp.zeros((n, din_p), jnp.float32).at[:, :din].set(x)
             if din_p != din else x)

    if num_layers == 1:
        out = _linear(x_pad, params["weights"][0], params["b_last"])
        return out[:, :output_dim]

    use_tiled = (n > block_rows) or (
        _single_block_vmem_estimate(n, params) > SINGLE_BLOCK_VMEM_BUDGET)
    if use_tiled:
        out = _mlp_tiled(x_pad, params, num_layers, block_rows)
    else:
        out = _mlp_fused(x_pad, params, num_layers)
    return out[:, :output_dim]


# ----------------------------------------------------------------------------
# Pure-JAX reference (PyTorch-faithful structure: hidden biases included, two-pass
# BN variance). Mirrors the kernels' mixed precision (bf16 MXU inputs, f32 accum).
# ----------------------------------------------------------------------------
def mlp_reference(params, x, num_layers):
    din_p = params["weights"][0].shape[0]
    n, din = x.shape
    h = x.astype(jnp.float32)
    if din_p != din:
        h = jnp.zeros((n, din_p), jnp.float32).at[:, :din].set(h)
    if num_layers == 1:
        return (jnp.dot(h.astype(jnp.bfloat16), params["weights"][0],
                        preferred_element_type=jnp.float32) + params["b_last"])
    bn = params["bn"]
    for l in range(num_layers - 1):
        y = (jnp.dot(h.astype(jnp.bfloat16), params["weights"][l],
                     preferred_element_type=jnp.float32)
             + params["hidden_biases"][l])
        mean = jnp.mean(y, axis=0, keepdims=True)
        var = jnp.mean((y - mean) ** 2, axis=0, keepdims=True)
        gamma = bn[2 * l:2 * l + 1, :]
        beta = bn[2 * l + 1:2 * l + 2, :]
        y = gamma * (y - mean) * jax.lax.rsqrt(var + BN_EPS) + beta
        h = jnp.maximum(y, 0.0)
    return (jnp.dot(h.astype(jnp.bfloat16), params["weights"][-1],
                    preferred_element_type=jnp.float32) + params["b_last"])


if __name__ == "__main__":
    num_layers = 3
    input_dim = 16
    hidden_dim = 32
    output_dim = 8

    key = jax.random.PRNGKey(0)
    kp, kx, kx2 = jax.random.split(key, 3)
    params = init_mlp_params(kp, num_layers, input_dim, hidden_dim, output_dim)

    # 1) Tiny batch -> single fused whole-MLP kernel (one pallas_call).
    n_small = 8
    x_small = jax.random.normal(kx, (n_small, input_dim), jnp.float32)
    out_small = jax.block_until_ready(
        mlp_forward(params, x_small, num_layers=num_layers, output_dim=output_dim))
    ref_small = mlp_reference(params, x_small, num_layers)[:, :output_dim]
    assert out_small.shape == (n_small, output_dim)
    assert jnp.allclose(out_small, ref_small, atol=2e-2, rtol=2e-2), float(
        jnp.max(jnp.abs(out_small - ref_small)))

    # 2) Larger batch -> row-tiled path (grid over N, two-pass BN stats, row mask).
    n_big = 600   # not a multiple of block_rows on purpose (exercises row masking)
    x_big = jax.random.normal(kx2, (n_big, input_dim), jnp.float32)
    out_big = jax.block_until_ready(
        mlp_forward(params, x_big, num_layers=num_layers, output_dim=output_dim))
    ref_big = mlp_reference(params, x_big, num_layers)[:, :output_dim]
    assert out_big.shape == (n_big, output_dim)
    assert jnp.allclose(out_big, ref_big, atol=2e-2, rtol=2e-2), float(
        jnp.max(jnp.abs(out_big - ref_big)))

    # 3) num_layers == 1 (plain linear) path.
    params1 = init_mlp_params(kp, 1, input_dim, hidden_dim, output_dim)
    out1 = jax.block_until_ready(
        mlp_forward(params1, x_small, num_layers=1, output_dim=output_dim))
    ref1 = mlp_reference(params1, x_small, 1)[:, :output_dim]
    assert out1.shape == (n_small, output_dim)
    assert jnp.allclose(out1, ref1, atol=2e-2, rtol=2e-2)

    print("KERNEL_OK")
</pallas_src>

<mosaic_0001>
module attributes {stable_mosaic.version = 11 : i64} {
  func.func @_mlp_fused_kernel(%arg0: memref<8x128xf32, #tpu.memory_space<vmem>>, %arg1: memref<128x128xbf16, #tpu.memory_space<vmem>>, %arg2: memref<128x128xbf16, #tpu.memory_space<vmem>>, %arg3: memref<128x128xbf16, #tpu.memory_space<vmem>>, %arg4: memref<4x128xf32, #tpu.memory_space<vmem>>, %arg5: memref<1x128xf32, #tpu.memory_space<vmem>>, %arg6: memref<8x128xf32, #tpu.memory_space<vmem>>) attributes {dimension_semantics = [], scalar_prefetch = 0 : i64, scratch_operands = 0 : i64, tpu.core_type = #tpu.core_type<tc>} {
    %c0 = arith.constant 0 : index
    %c0_0 = arith.constant 0 : index
    %0 = vector.load %arg4[%c0, %c0_0] : memref<4x128xf32, #tpu.memory_space<vmem>>, vector<4x128xf32>
    %c0_1 = arith.constant 0 : index
    %c0_2 = arith.constant 0 : index
    %1 = vector.load %arg0[%c0_1, %c0_2] : memref<8x128xf32, #tpu.memory_space<vmem>>, vector<8x128xf32>
    %2 = arith.truncf %1 : vector<8x128xf32> to vector<8x128xbf16>
    %c0_3 = arith.constant 0 : index
    %c0_4 = arith.constant 0 : index
    %3 = vector.load %arg1[%c0_3, %c0_4] : memref<128x128xbf16, #tpu.memory_space<vmem>>, vector<128x128xbf16>
    %cst = arith.constant dense<0.000000e+00> : vector<8x128xf32>
    %4 = tpu.matmul %2, %3, %cst {dimension_numbers = #tpu.dot_dimension_numbers<[1], [0], [0], [1], [0, 0, 1, 1], [], []>} : vector<8x128xbf16>, vector<128x128xbf16>, vector<8x128xf32> -> vector<8x128xf32>
    %cst_5 = arith.constant 1.000000e+00 : f32
    %5 = vector.broadcast %cst_5 : f32 to vector<8x8xf32>
    %cst_6 = arith.constant dense<0.000000e+00> : vector<8x128xf32>
    %6 = tpu.matmul %5, %4, %cst_6 {dimension_numbers = #tpu.dot_dimension_numbers<[1], [0], [0], [1], [0, 0, 1, 1], [], []>} : vector<8x8xf32>, vector<8x128xf32>, vector<8x128xf32> -> vector<8x128xf32>
    %7 = vector.extract_strided_slice %6 {offsets = [0, 0], sizes = [1, 128], strides = [1, 1]} : vector<8x128xf32> to vector<1x128xf32>
    %8 = arith.mulf %4, %4 : vector<8x128xf32>
    %cst_7 = arith.constant dense<0.000000e+00> : vector<8x128xf32>
    %9 = tpu.matmul %5, %8, %cst_7 {dimension_numbers = #tpu.dot_dimension_numbers<[1], [0], [0], [1], [0, 0, 1, 1], [], []>} : vector<8x8xf32>, vector<8x128xf32>, vector<8x128xf32> -> vector<8x128xf32>
    %10 = vector.extract_strided_slice %9 {offsets = [0, 0], sizes = [1, 128], strides = [1, 1]} : vector<8x128xf32> to vector<1x128xf32>
    %11 = vector.extract_strided_slice %0 {offsets = [0, 0], sizes = [1, 128], strides = [1, 1]} : vector<4x128xf32> to vector<1x128xf32>
    %12 = vector.extract_strided_slice %0 {offsets = [1, 0], sizes = [1, 128], strides = [1, 1]} : vector<4x128xf32> to vector<1x128xf32>
    %cst_8 = arith.constant 1.250000e-01 : f32
    %13 = vector.broadcast %cst_8 : f32 to vector<1x128xf32>
    %14 = arith.mulf %7, %13 : vector<1x128xf32>
    %cst_9 = arith.constant 1.250000e-01 : f32
    %15 = vector.broadcast %cst_9 : f32 to vector<1x128xf32>
    %16 = arith.mulf %10, %15 : vector<1x128xf32>
    %17 = arith.mulf %14, %14 : vector<1x128xf32>
    %18 = arith.subf %16, %17 : vector<1x128xf32>
    %cst_10 = arith.constant 0.000000e+00 : f32
    %19 = vector.broadcast %cst_10 : f32 to vector<1x128xf32>
    %20 = arith.maximumf %18, %19 : vector<1x128xf32>
    %cst_11 = arith.constant 9.99999974E-6 : f32
    %21 = vector.broadcast %cst_11 : f32 to vector<1x128xf32>
    %22 = arith.addf %20, %21 : vector<1x128xf32>
    %23 = math.rsqrt %22 : vector<1x128xf32>
    %24 = arith.mulf %11, %23 : vector<1x128xf32>
    %25 = arith.mulf %24, %14 : vector<1x128xf32>
    %26 = arith.subf %12, %25 : vector<1x128xf32>
    %27 = vector.broadcast %24 : vector<1x128xf32> to vector<8x128xf32>
    %28 = arith.mulf %27, %4 : vector<8x128xf32>
    %29 = vector.broadcast %26 : vector<1x128xf32> to vector<8x128xf32>
    %30 = arith.addf %28, %29 : vector<8x128xf32>
    %cst_12 = arith.constant 0.000000e+00 : f32
    %31 = vector.broadcast %cst_12 : f32 to vector<8x128xf32>
    %32 = arith.maximumf %30, %31 : vector<8x128xf32>
    %33 = arith.truncf %32 : vector<8x128xf32> to vector<8x128xbf16>
    %c0_13 = arith.constant 0 : index
    %c0_14 = arith.constant 0 : index
    %34 = vector.load %arg2[%c0_13, %c0_14] : memref<128x128xbf16, #tpu.memory_space<vmem>>, vector<128x128xbf16>
    %cst_15 = arith.constant dense<0.000000e+00> : vector<8x128xf32>
    %35 = tpu.matmul %33, %34, %cst_15 {dimension_numbers = #tpu.dot_dimension_numbers<[1], [0], [0], [1], [0, 0, 1, 1], [], []>} : vector<8x128xbf16>, vector<128x128xbf16>, vector<8x128xf32> -> vector<8x128xf32>
    %cst_16 = arith.constant 1.000000e+00 : f32
    %36 = vector.broadcast %cst_16 : f32 to vector<8x8xf32>
    %cst_17 = arith.constant dense<0.000000e+00> : vector<8x128xf32>
    %37 = tpu.matmul %36, %35, %cst_17 {dimension_numbers = #tpu.dot_dimension_numbers<[1], [0], [0], [1], [0, 0, 1, 1], [], []>} : vector<8x8xf32>, vector<8x128xf32>, vector<8x128xf32> -> vector<8x128xf32>
    %38 = vector.extract_strided_slice %37 {offsets = [0, 0], sizes = [1, 128], strides = [1, 1]} : vector<8x128xf32> to vector<1x128xf32>
    %39 = arith.mulf %35, %35 : vector<8x128xf32>
    %cst_18 = arith.constant dense<0.000000e+00> : vector<8x128xf32>
    %40 = tpu.matmul %36, %39, %cst_18 {dimension_numbers = #tpu.dot_dimension_numbers<[1], [0], [0], [1], [0, 0, 1, 1], [], []>} : vector<8x8xf32>, vector<8x128xf32>, vector<8x128xf32> -> vector<8x128xf32>
    %41 = vector.extract_strided_slice %40 {offsets = [0, 0], sizes = [1, 128], strides = [1, 1]} : vector<8x128xf32> to vector<1x128xf32>
    %42 = vector.extract_strided_slice %0 {offsets = [2, 0], sizes = [1, 128], strides = [1, 1]} : vector<4x128xf32> to vector<1x128xf32>
    %43 = vector.extract_strided_slice %0 {offsets = [3, 0], sizes = [1, 128], strides = [1, 1]} : vector<4x128xf32> to vector<1x128xf32>
    %cst_19 = arith.constant 1.250000e-01 : f32
    %44 = vector.broadcast %cst_19 : f32 to vector<1x128xf32>
    %45 = arith.mulf %38, %44 : vector<1x128xf32>
    %cst_20 = arith.constant 1.250000e-01 : f32
    %46 = vector.broadcast %cst_20 : f32 to vector<1x128xf32>
    %47 = arith.mulf %41, %46 : vector<1x128xf32>
    %48 = arith.mulf %45, %45 : vector<1x128xf32>
    %49 = arith.subf %47, %48 : vector<1x128xf32>
    %cst_21 = arith.constant 0.000000e+00 : f32
    %50 = vector.broadcast %cst_21 : f32 to vector<1x128xf32>
    %51 = arith.maximumf %49, %50 : vector<1x128xf32>
    %cst_22 = arith.constant 9.99999974E-6 : f32
    %52 = vector.broadcast %cst_22 : f32 to vector<1x128xf32>
    %53 = arith.addf %51, %52 : vector<1x128xf32>
    %54 = math.rsqrt %53 : vector<1x128xf32>
    %55 = arith.mulf %42, %54 : vector<1x128xf32>
    %56 = arith.mulf %55, %45 : vector<1x128xf32>
    %57 = arith.subf %43, %56 : vector<1x128xf32>
    %58 = vector.broadcast %55 : vector<1x128xf32> to vector<8x128xf32>
    %59 = arith.mulf %58, %35 : vector<8x128xf32>
    %60 = vector.broadcast %57 : vector<1x128xf32> to vector<8x128xf32>
    %61 = arith.addf %59, %60 : vector<8x128xf32>
    %cst_23 = arith.constant 0.000000e+00 : f32
    %62 = vector.broadcast %cst_23 : f32 to vector<8x128xf32>
    %63 = arith.maximumf %61, %62 : vector<8x128xf32>
    %64 = arith.truncf %63 : vector<8x128xf32> to vector<8x128xbf16>
    %c0_24 = arith.constant 0 : index
    %c0_25 = arith.constant 0 : index
    %65 = vector.load %arg3[%c0_24, %c0_25] : memref<128x128xbf16, #tpu.memory_space<vmem>>, vector<128x128xbf16>
    %cst_26 = arith.constant dense<0.000000e+00> : vector<8x128xf32>
    %66 = tpu.matmul %64, %65, %cst_26 {dimension_numbers = #tpu.dot_dimension_numbers<[1], [0], [0], [1], [0, 0, 1, 1], [], []>} : vector<8x128xbf16>, vector<128x128xbf16>, vector<8x128xf32> -> vector<8x128xf32>
    %c0_27 = arith.constant 0 : index
    %c0_28 = arith.constant 0 : index
    %67 = vector.load %arg5[%c0_27, %c0_28] : memref<1x128xf32, #tpu.memory_space<vmem>>, vector<1x128xf32>
    %68 = vector.broadcast %67 : vector<1x128xf32> to vector<8x128xf32>
    %69 = arith.addf %66, %68 : vector<8x128xf32>
    %c0_29 = arith.constant 0 : index
    %c0_30 = arith.constant 0 : index
    %70 = vector.load %arg6[%c0_29, %c0_30] : memref<8x128xf32, #tpu.memory_space<vmem>>, vector<8x128xf32>
    tpu.vector_store %arg6[%c0_29, %c0_30], %69 {strides = array<i32>} : memref<8x128xf32, #tpu.memory_space<vmem>>, vector<8x128xf32>,
    return
  }
}

</mosaic_0001>

<bundles_post_ra>
// kernel: mlp_forward.1
= control target key start
LH: loop header
LB: loop body
LE: loop exit
PB: predicated region body
PF: predicated region fallthrough
CT: control target
= control target key end

     0   :  { %11 = vsyncpa [#allocation3], 0  ;;  %s781_s0 = inlined_call_operand.vmem [shape: f32[8,128], index: 0, kind: input, shape index: {}]   ;;  %s782_s1 = inlined_call_operand.hbm [shape: bf16[128,128], index: 1, kind: input, shape index: {}]   ;;  %s783_s2 = inlined_call_operand.hbm [shape: bf16[128,128], index: 2, kind: input, shape index: {}]   ;;  %s784_s3 = inlined_call_operand.hbm [shape: bf16[128,128], index: 3, kind: input, shape index: {}]   ;;  %s785_s4 = inlined_call_operand.vmem [shape: f32[4,128], index: 4, kind: input, shape index: {}]   ;;  %s786_s5 = inlined_call_operand.vmem [shape: f32[1,128], index: 5, kind: input, shape index: {}]   ;;  %s787_s6 = inlined_call_operand.hbm [shape: f32[8,128], index: 6, kind: output, shape index: {}]  }
   0x1   :  { %12 = vsyncpa [#allocation6], 0 }
   0x2   :  { %13 = vsyncpa [#allocation4], 0  ;;  %s33_s23 = sshll.u32 %s783_s2, 4  ;;  %s714_s24 = smov [#allocation5]   ;;  %s34_s23 = int_to_ptr.hbm [resolvable:$true] %s33_s23 }
   0x3   :  { %s35_s25 = sshll.u32 %s714_s24, 4  ;;  %s20_s28 = sshll.u32 %s782_s1, 4  ;;  %s36_s25 = int_to_ptr.vmem [resolvable:$true] %s35_s25  ;;  %s21_s28 = int_to_ptr.hbm [resolvable:$true] %s20_s28 }
   0x4   :  { %s715_s29 = smov 64   ;;  %s716_s30 = smov 4  }
   0x5   :  { %41 = dma.hbm_to_vmem [thread:$0]  %s34_s23, 1024, %s36_s25, [#allocation6], %s715_s29, %s715_s29, %s716_s30  }
   0x6   :  { %s717_s7 = smov [#allocation2]   ;;  %s46_s11 = sshll.u32 %s784_s3, 4  ;;  %s47_s11 = int_to_ptr.hbm [resolvable:$true] %s46_s11 }
   0x7   :  { %s22_s8 = sshll.u32 %s717_s7, 4  ;;  %s718_s2 = smov [#allocation7]   ;;  %s23_s8 = int_to_ptr.vmem [resolvable:$true] %s22_s8 }
   0x8   :  { %28 = dma.hbm_to_vmem [thread:$0]  %s21_s28, 1024, %s23_s8, [#allocation3], %s715_s29, %s715_s29, %s716_s30  }
   0x9   :  { %s48_s12 = sshll.u32 %s718_s2, 4  ;;  %s49_s12 = int_to_ptr.vmem [resolvable:$true] %s48_s12 }
   0xa   :  { %54 = dma.hbm_to_vmem [thread:$0]  %s47_s11, 1024, %s49_s12, [#allocation6], %s715_s29, %s715_s29, %s716_s30  }
   0xb   :  { %708 = dma.done.wait [#allocation3], 1024  }
   0xc   :  { %709 = vsyncadd [#allocation3], 4294966272 }
   0xd   :  { %710 = dma.done.wait [#allocation6], 2048  }
   0xe   :  { %711 = vsyncadd [#allocation6], 4294965248  ;;  %v583_v0 = vld [vmem:[#allocation2 + $0x38] sm:$0xff]  ;;  %v582_v1 = vld [vmem:[#allocation2 + $0x30] sm:$0xff]  ;;  %vm151_vm0 = vcmask 64512   ;;  %v719_v12 = vmov 1.0  }
   0xf   :  { %138 = vmatpush.bf16.msra.mxu0 %v583_v0  ;;  %v581_v2 = vld [vmem:[#allocation2 + $0x28] sm:$0xff]  ;;  %v580_v3 = vld [vmem:[#allocation2 + $0x20] sm:$0xff]  ;;  %v579_v4 = vld [vmem:[#allocation2 + $0x18] sm:$0xff]  ;;  %s720_s15 = smov [#allocation8]   ;;  %s465_s19 = sshll.u32 %s787_s6, 4  ;;  %s466_s19 = int_to_ptr.hbm [resolvable:$true] %s465_s19 }
  0x10   :  { %v578_v5 = vld [vmem:[#allocation2 + $0x10] sm:$0xff]  ;;  %v577_v6 = vld [vmem:[#allocation2 + $0x8] sm:$0xff]  ;;  %v576_v7 = vld [vmem:[#allocation2] sm:$0xff]  ;;  %s463_s16 = sshll.u32 %s720_s15, 4  ;;  %s464_s16 = int_to_ptr.vmem [resolvable:$true] %s463_s16 }
  0x11   :  { %v72_v8 = vld [vmem:[%s781_s0] sm:$0xff]  ;;  %v591_v14 = vld [vmem:[#allocation5 + $0x38] sm:$0xff]  ;;  %v590_v15 = vld [vmem:[#allocation5 + $0x30] sm:$0xff] }
  0x12   :  { %v73_v9 = vpack.c.bf16 %v72_v8, %v72_v8  ;;  %288 = vmatpush.bf16.msra.mxu3 %v591_v14  ;;  %v589_v16 = vld [vmem:[#allocation5 + $0x28] sm:$0xff]  ;;  %v588_v17 = vld [vmem:[#allocation5 + $0x20] sm:$0xff]  ;;  %v587_v19 = vld [vmem:[#allocation5 + $0x18] sm:$0xff] }
  0x13   :  { %139 = vmatpush.bf16.msra.mxu0 %v582_v1  ;;  %v586_v20 = vld [vmem:[#allocation5 + $0x10] sm:$0xff]  ;;  %v585_v23 = vld [vmem:[#allocation5 + $0x8] sm:$0xff]  ;;  %v584_v27 = vld [vmem:[#allocation5] sm:$0xff] }
  0x14   :  { %v71_v36 = vld [vmem:[%s785_s4] sm:$0xf]  ;;  %v599_v51 = vld [vmem:[#allocation7 + $0x38] sm:$0xff]  ;;  %v598_v52 = vld [vmem:[#allocation7 + $0x30] sm:$0xff] }
  0x15   :  { %444 = vmatpush.bf16.msra.mxu1 %v599_v51  ;;  %v597_v53 = vld [vmem:[#allocation7 + $0x28] sm:$0xff]  ;;  %v596_v55 = vld [vmem:[#allocation7 + $0x20] sm:$0xff]  ;;  %v595_v56 = vld [vmem:[#allocation7 + $0x18] sm:$0xff] }
  0x16   :  { %289 = vmatpush.bf16.msra.mxu3 %v590_v15  ;;  %v594_v58 = vld [vmem:[#allocation7 + $0x10] sm:$0xff]  ;;  %v593_v62 = vld [vmem:[#allocation7 + $0x8] sm:$0xff]  ;;  %v592_v1 = vld [vmem:[#allocation7] sm:$0xff] }
  0x17   :  { %140 = vmatpush.bf16.msra.mxu0 %v581_v2 }
  0x19   :  { %445 = vmatpush.bf16.msra.mxu1 %v598_v52 }
  0x1a   :  { %290 = vmatpush.bf16.msra.mxu3 %v589_v16 }
  0x1b   :  { %141 = vmatpush.bf16.msra.mxu0 %v580_v3 }
  0x1d   :  { %446 = vmatpush.bf16.msra.mxu1 %v597_v53 }
  0x1e   :  { %291 = vmatpush.bf16.msra.mxu3 %v588_v17 }
  0x1f   :  { %142 = vmatpush.bf16.msra.mxu0 %v579_v4 }
  0x21   :  { %447 = vmatpush.bf16.msra.mxu1 %v596_v55 }
  0x22   :  { %292 = vmatpush.bf16.msra.mxu3 %v587_v19 }
  0x23   :  { %143 = vmatpush.bf16.msra.mxu0 %v578_v5 }
  0x25   :  { %448 = vmatpush.bf16.msra.mxu1 %v595_v56 }
  0x26   :  { %293 = vmatpush.bf16.msra.mxu3 %v586_v20 }
  0x27   :  { %144 = vmatpush.bf16.msra.mxu0 %v577_v6 }
  0x29   :  { %449 = vmatpush.bf16.msra.mxu1 %v594_v58 }
  0x2a   :  { %294 = vmatpush.bf16.msra.mxu3 %v585_v23 }
  0x2b   :  { %145 = vmatpush.bf16.msra.mxu0 %v576_v7 }
  0x2d   :  { %450 = vmatpush.bf16.msra.mxu1 %v593_v62 }
  0x2e   :  { %146 = vmatmul.bf16.vlgmr.msra.gmra.mxu0 %v73_v9  ;;  %295 = vmatpush.bf16.msra.mxu3 %v584_v27 }
  0x31   :  { %451 = vmatpush.bf16.msra.mxu1 %v592_v1 }
  0xab   :  { %v147_v10 = vpop.f32.mrf.mxu0 }
  0xac   :  { %170 = vmatpush.msra.mxu2 %v147_v10  ;;  %v175_v11 = vmul.f32 %v147_v10, %v147_v10 }
  0xad   :  { %508 = vmatmul.msk.f32.vlgmr.msra.gmra.mxu2 %vm151_vm0, %v719_v12 }
  0xae   :  { %191 = vmatpush.msrb.mxu2 %v175_v11 }
  0xb3   :  { %v149_v13 = vpop.f32.mrf.mxu0 }
  0xb5   :  { %509 = vmatmul.msk.f32.vlgmr.msrb.gmra.mxu2 %vm151_vm0, %v719_v12 }
 0x130   :  { %v172_v18 = vpop.f32.mrf.mxu2 }
 0x131   :  { %v196_v21 = vmul.f32 0.125, %v172_v18 }
 0x133   :  { %v198_v24 = vmul.f32 %v196_v21, %v196_v21 }
 0x138   :  { %v193_v22 = vpop.f32.mrf.mxu2 }
 0x139   :  { %v197_v25 = vmul.f32 0.125, %v193_v22  ;;  %v607_v22 = vld [vmem:[%s786_s5] ss:$0 sm:$0xff] }
 0x13b   :  { %v199_v26 = vsub.f32 %v197_v25, %v198_v24 }
 0x13d   :  { %v200_v28 = vmax.f32 %v199_v26, 0.0 }
 0x13f   :  { %v201_v29 = vadd.f32 1e-05, %v200_v28 }
 0x141   :  { %608 = vrsqrt.f32 %v201_v29  ;;  %vm208_vm2 = vweird.f32 %v201_v29 }
 0x147   :  { %v609_v30 = vpop.eup %608 }
 0x148   :  { %v203_v31 = vmul.f32 %v609_v30, %v201_v29  ;;  %vm209_vm1 = vweird.f32 %v609_v30 }
 0x149   :  { %vm210_vm3 = vmor %vm208_vm2, %vm209_vm1 }
 0x14a   :  { %v204_v32 = vmul.f32 %v609_v30, %v203_v31 }
 0x14c   :  { %v205_v33 = vmul.f32 0.5, %v204_v32 }
 0x14e   :  { %v206_v34 = vsub.f32 1.5, %v205_v33 }
 0x150   :  { %v207_v35 = vmul.f32 %v609_v30, %v206_v34 }
 0x152   :  { %v211_v37 = vsel %vm210_vm3, %v609_v30, %v207_v35 }
 0x153   :  { %v212_v38 = vmul.f32 %v211_v37, %v71_v36 }
 0x155   :  { %v213_v39 = vmul.f32 %v212_v38, %v196_v21  ;;  %v218_v41 = vperm.slane %v212_v38, 0 }
 0x157   :  { %v215_v40 = vrot.slane %v213_v39, 7  ;;  %v219_v43 = vmul.f32 %v218_v41, %v147_v10 }
 0x159   :  { %v217_v42 = vsub.f32 %v71_v36, %v215_v40 }
 0x15b   :  { %v220_v44 = vperm.slane %v217_v42, 1 }
 0x15d   :  { %v221_v45 = vadd.f32 %v220_v44, %v219_v43 }
 0x15f   :  { %v222_v46 = vmax.f32 %v221_v45, 0.0 }
 0x161   :  { %v223_v47 = vpack.c.bf16 %v222_v46, %v222_v46 }
 0x163   :  { %296 = vmatmul.bf16.vlgmr.msra.gmra.mxu3 %v223_v47 }
 0x1e6   :  { %v297_v48 = vpop.f32.mrf.mxu3 }
 0x1e7   :  { %v321_v49 = vmul.f32 %v297_v48, %v297_v48  ;;  %316 = vmatpush.msra.mxu2 %v297_v48 }
 0x1e8   :  { %542 = vmatmul.msk.f32.vlgmr.msra.gmra.mxu2 %vm151_vm0, %v719_v12 }
 0x1e9   :  { %337 = vmatpush.msrb.mxu2 %v321_v49 }
 0x1ee   :  { %v299_v50 = vpop.f32.mrf.mxu3 }
 0x1f0   :  { %543 = vmatmul.msk.f32.vlgmr.msrb.gmra.mxu2 %vm151_vm0, %v719_v12 }
 0x26b   :  { %v318_v54 = vpop.f32.mrf.mxu2 }
 0x26c   :  { %v342_v57 = vmul.f32 0.125, %v318_v54 }
 0x26e   :  { %v344_v60 = vmul.f32 %v342_v57, %v342_v57  ;;  %v363_v11 = vrot.slane %v342_v57, 6 }
 0x273   :  { %v339_v59 = vpop.f32.mrf.mxu2 }
 0x274   :  { %v343_v61 = vmul.f32 0.125, %v339_v59 }
 0x276   :  { %v345_v63 = vsub.f32 %v343_v61, %v344_v60 }
 0x278   :  { %v346_v0 = vmax.f32 %v345_v63, 0.0 }
 0x27a   :  { %v347_v2 = vadd.f32 1e-05, %v346_v0 }
 0x27c   :  { %610 = vrsqrt.f32 %v347_v2  ;;  %vm354_vm5 = vweird.f32 %v347_v2 }
 0x282   :  { %v611_v3 = vpop.eup %610 }
 0x283   :  { %v349_v4 = vmul.f32 %v611_v3, %v347_v2  ;;  %vm355_vm4 = vweird.f32 %v611_v3 }
 0x284   :  { %vm356_vm6 = vmor %vm354_vm5, %vm355_vm4 }
 0x285   :  { %v350_v5 = vmul.f32 %v611_v3, %v349_v4 }
 0x287   :  { %v351_v6 = vmul.f32 0.5, %v350_v5 }
 0x289   :  { %v352_v7 = vsub.f32 1.5, %v351_v6 }
 0x28b   :  { %v353_v8 = vmul.f32 %v611_v3, %v352_v7 }
 0x28d   :  { %v357_v9 = vsel %vm356_vm6, %v611_v3, %v353_v8 }
 0x28e   :  { %v359_v10 = vrot.slane %v357_v9, 6 }
 0x290   :  { %v361_v12 = vmul.f32 %v359_v10, %v71_v36 }
 0x292   :  { %v365_v13 = vmul.f32 %v363_v11, %v361_v12  ;;  %v370_v15 = vperm.slane %v361_v12, 2 }
 0x294   :  { %v367_v14 = vrot.slane %v365_v13, 7  ;;  %v371_v17 = vmul.f32 %v370_v15, %v297_v48 }
 0x296   :  { %v369_v16 = vsub.f32 %v71_v36, %v367_v14 }
 0x298   :  { %v372_v18 = vperm.slane %v369_v16, 3 }
 0x29a   :  { %v373_v19 = vadd.f32 %v372_v18, %v371_v17 }
 0x29c   :  { %v374_v20 = vmax.f32 %v373_v19, 0.0 }
 0x29e   :  { %v375_v21 = vpack.c.bf16 %v374_v20, %v374_v20 }
 0x2a0   :  { %452 = vmatmul.bf16.vlgmr.msra.gmra.mxu1 %v375_v21 }
 0x31d   :  { %v453_v23 = vpop.f32.mrf.mxu1 }
 0x31e   :  { %v454_v24 = vadd.f32 %v607_v22, %v453_v23 }
 0x320   :  { %457 = vst [vmem:[#allocation8] sm:$0xff] %v454_v24 }
 0x321   :  { %468 = dma.vmem_to_hbm [thread:$0]  %s464_s16, 128, %s466_s19, [#allocation4]  }
 0x325   :  { %v455_v25 = vpop.f32.mrf.mxu1 }
 0x326   :  { %712 = dma.done.wait [#allocation4], 128  }
 0x327   :  { %713 = vsyncadd [#allocation4], 4294967168 }
 0x328   :  { %473 = vsyncpa [#allocation3], 1 }
 0x329   :  { %474 = vsyncpa [#allocation6], 1 }
 0x32a   :  { %475 = vsyncpa [#allocation4], 1 }

</bundles_post_ra>
